<compile_context>
chip_gen: v7x
topology: tpu7x:2x2x1
jax: 0.10.0
libtpu: 0.0.40
codegen_flags: <defaults>
</compile_context>

<pallas_src>
import jax
import jax.numpy as jnp
from jax.experimental import pallas as pl
from jax.experimental.pallas import tpu as pltpu


def _round_up(x, m):
    return (x + m - 1) // m * m


def critic_kernel(xat_ref, pt_ref,
                  w1_ref, b1_ref,
                  w23_ref, b23_ref,
                  w4_ref, b4_ref,
                  wv_ref, bv_ref,
                  out_ref):
    """One batch tile (batch in the LANE dimension) of the fused Critic forward.

    xat_ref : [ni+na, tb]      bf16  packed [inputs ; actions], transposed
    pt_ref  : [h0+na, 1]       f32   ReLU pass-through multiplier (0 -> ReLU row)
    w1_ref  : [h0+na, ni+na]   bf16  augmented linear1 = [[W1, 0], [0, I]]
    w23_ref : [h1+h2, h0+na]   bf16  block-diag(W2, W3)  (fused linear2/linear3)
    w4_ref  : [h3, h1+h2]      bf16  linear4
    wv_ref  : [h3, 1]          f32   V head column (VPU mul + sublane reduce)
    out_ref : [1, tb]          f32   lane-dense V row for this tile
    """
    xat = xat_ref[...]

    # Stage 1 (MXU): y1 = [W1 @ x + b1 ; a]  (f32 accumulate).
    y1 = jnp.dot(w1_ref[...], xat, preferred_element_type=jnp.float32) + b1_ref[...]
    # ReLU on the linear1 rows only; action rows pass through untouched.
    #   pass-through row (pt=1): max(y, y*1) = y ;  ReLU row (pt=0): max(y, 0).
    y1 = jnp.maximum(y1, y1 * pt_ref[...])

    # Stage 2 (MXU): block-diag(W2, W3) -> [W2 h1 ; W3 a] already concatenated,
    # so torch.cat((x, actions), 1) never materializes in-kernel.
    y2 = (jnp.dot(w23_ref[...], y1.astype(w23_ref.dtype),
                  preferred_element_type=jnp.float32) + b23_ref[...])

    # Stage 3 (MXU): linear4 + ReLU.
    h4 = (jnp.dot(w4_ref[...], y2.astype(w4_ref.dtype),
                  preferred_element_type=jnp.float32) + b4_ref[...])
    h4 = jnp.maximum(h4, 0.0)

    # V head (out_features = 1): VPU multiply + sublane reduce; the result is
    # already a lane-dense (1, tb) row -- no transpose, no 1-lane MXU matmul.
    v = jnp.sum(h4 * wv_ref[...], axis=0, keepdims=True) + bv_ref[...]
    out_ref[...] = v.astype(out_ref.dtype)


def critic_forward(inputs, actions, params, *, target_steps=2, max_block_b=4096):
    """inputs: [B, num_inputs] f32, actions: [B, num_outputs] f32 -> V: [B, 1] f32."""
    B, num_inputs = inputs.shape
    num_outputs = actions.shape[1]
    f_in = num_inputs + num_outputs
    h0na = params["w1"].shape[0]
    h12 = params["w23"].shape[0]
    h3 = params["w4"].shape[0]
    assert params["w1"].shape[1] == f_in

    # Pack + transpose host-side (layout plumbing): batch lives in the lane
    # dimension so the kernel's stores are lane-dense and the V head needs no
    # in-kernel transpose. bf16 MXU operands.
    xat = jnp.concatenate([inputs.T, actions.T], axis=0).astype(jnp.bfloat16)  # (f_in, B)

    # Batch tile: lane-dim blocks must be multiples of 128. Aim for a short
    # grid (>= 2 steps only when B is large enough -- keeps both v7x TCs busy
    # under dimension_semantics="parallel"), and cap the tile so activations
    # stay comfortably inside VMEM on every chip (v7x has only 64 MiB).
    tb = _round_up(pl.cdiv(B, target_steps), 128)
    tb = max(128, min(tb, max_block_b))
    Bp = _round_up(B, tb)
    if Bp != B:
        xat = jnp.pad(xat, ((0, 0), (0, Bp - B)))   # zero cols: benign, sliced off
    grid = (Bp // tb,)

    resident = (params["pt"],
                params["w1"], params["b1"],
                params["w23"], params["b23"],
                params["w4"], params["b4"],
                params["wv"], params["bv"])

    # Activation tiles stream (default double-buffering -- depth 3 buys nothing
    # at these DMA sizes); weights/biases use a constant index_map so they are
    # DMA'd once and stay resident in VMEM across the whole grid.
    xat_spec = pl.BlockSpec((f_in, tb), lambda i: (0, i))
    res_specs = [pl.BlockSpec(p.shape, lambda i: (0, 0)) for p in resident]
    out_spec = pl.BlockSpec((1, tb), lambda i: (0, i))     # lane-dense output row

    # Advisory cost + VMEM budget (lane-padded footprint, 2x headroom).
    weight_bytes = sum(int(p.size) * p.dtype.itemsize for p in resident)
    flops = 2 * Bp * (f_in * h0na + h0na * h12 + h12 * h3 + h3)
    cost = pl.CostEstimate(flops=flops, transcendentals=0,
                           bytes_accessed=Bp * f_in * 2 + Bp * 4 + weight_bytes)
    per_lane_bytes = (2 * 2 * _round_up(f_in, 16)      # bf16 input tile, 2 buffers
                      + 6 * (h0na + h12 + h3)          # f32 intermediates + bf16 casts
                      + 2 * 4)                         # f32 output row, 2 buffers
    vmem_limit = int(min(64 * 1024 * 1024,
                         max(32 * 1024 * 1024,
                             2 * (tb * per_lane_bytes + weight_bytes))))

    out = pl.pallas_call(
        critic_kernel,
        out_shape=jax.ShapeDtypeStruct((1, Bp), jnp.float32),
        grid=grid,
        in_specs=[xat_spec] + res_specs,
        out_specs=out_spec,
        cost_estimate=cost,
        compiler_params=pltpu.CompilerParams(
            dimension_semantics=("parallel",),   # v7x: batch tiles split over 2 TCs
            vmem_limit_bytes=vmem_limit),
    )(xat, *resident)
    return out[0, :B].reshape(B, 1)


def init_linear(key, fan_in, fan_out):
    """PyTorch nn.Linear init: W [out, in], b [out], uniform(+-1/sqrt(fan_in))."""
    kw, kb = jax.random.split(key)
    bound = 1.0 / (fan_in ** 0.5)
    w = jax.random.uniform(kw, (fan_out, fan_in), jnp.float32, -bound, bound)
    b = jax.random.uniform(kb, (fan_out,), jnp.float32, -bound, bound)
    return w, b


def make_params(key, num_inputs, num_outputs, hidden_size):
    h0, h1, h2, h3 = hidden_size
    na = num_outputs
    k1, k2, k3, k4, k5 = jax.random.split(key, 5)
    w1, b1 = init_linear(k1, num_inputs, h0)        # (h0, ni)
    w2, b2 = init_linear(k2, h0, h1)                 # (h1, h0)
    w3, b3 = init_linear(k3, num_outputs, h2)        # (h2, na)
    w4, b4 = init_linear(k4, h1 + h2, h3)            # (h3, h1+h2)
    wv, bv = init_linear(k5, h3, 1)                  # (1, h3), (1,)

    # Stage-1 augmented weight: W1aug @ [x ; a] = [W1 x ; a].
    w1aug = jnp.zeros((h0 + na, num_inputs + na), jnp.float32)
    w1aug = w1aug.at[:h0, :num_inputs].set(w1)
    w1aug = w1aug.at[h0:, num_inputs:].set(jnp.eye(na, dtype=jnp.float32))
    b1aug = jnp.concatenate([b1, jnp.zeros((na,), jnp.float32)]).reshape(-1, 1)

    # Stage-2 block-diagonal weight: block-diag(W2, W3) @ [h1 ; a] = [W2 h1 ; W3 a].
    w23 = jnp.zeros((h1 + h2, h0 + na), jnp.float32)
    w23 = w23.at[:h1, :h0].set(w2)
    w23 = w23.at[h1:, h0:].set(w3)
    b23 = jnp.concatenate([b2, b3]).reshape(-1, 1)

    # ReLU pass-through multiplier: 0 on linear1 rows (ReLU), 1 on action rows.
    pt = jnp.concatenate([jnp.zeros((h0,), jnp.float32),
                          jnp.ones((na,), jnp.float32)]).reshape(-1, 1)

    return dict(
        # bf16 MXU operands (f32 accumulate in-kernel).
        w1=w1aug.astype(jnp.bfloat16),
        w23=w23.astype(jnp.bfloat16),
        w4=w4.astype(jnp.bfloat16),
        # biases + V head + mask stay f32 (VPU work), stored as columns.
        b1=b1aug, b23=b23, b4=b4.reshape(-1, 1),
        wv=wv.reshape(-1, 1),         # (h3, 1) column for VPU mul + sublane reduce
        bv=bv.reshape(1, 1),          # (1, 1)
        pt=pt,                        # (h0+na, 1)
    )


def critic_reference(inputs, actions, p, num_inputs, hidden_size):
    """Mirrors the PyTorch Critic.forward (5 separate linears + torch.cat),
    using the same bf16-rounded weights and the same bf16 operand casts as the
    kernel so the comparison is tight."""
    h0, h1, h2, h3 = hidden_size
    w1aug = p["w1"].astype(jnp.float32)
    w23 = p["w23"].astype(jnp.float32)
    w1 = w1aug[:h0, :num_inputs]
    w2 = w23[:h1, :h0]
    w3 = w23[h1:, h0:]
    w4 = p["w4"].astype(jnp.float32)
    b1 = p["b1"][:h0, 0]
    b2 = p["b23"][:h1, 0]
    b3 = p["b23"][h1:, 0]
    b4 = p["b4"][:, 0]
    wv = p["wv"][:, 0]
    bv = p["bv"][0, 0]

    bf = lambda t: t.astype(jnp.bfloat16).astype(jnp.float32)

    x = jnp.maximum(bf(inputs) @ w1.T + b1, 0.0)          # linear1 + relu
    x = bf(x) @ w2.T + b2                                  # linear2
    a = bf(actions) @ w3.T + b3                            # linear3
    x = jnp.concatenate([x, a], axis=1)                    # torch.cat
    x = jnp.maximum(bf(x) @ w4.T + b4, 0.0)                # linear4 + relu
    return (x @ wv + bv).reshape(-1, 1)                    # V


if __name__ == "__main__":
    # Shapes consistent with the module: state dim 16, action dim 4,
    # hidden_size = [32, 32, 32, 32]. Batch 256 with 128-lane tiles gives a
    # 2-step "parallel" grid (exercises the pipeline / both v7x TCs).
    B, num_inputs, num_outputs = 256, 16, 4
    hidden_size = (32, 32, 32, 32)

    key = jax.random.PRNGKey(0)
    k_params, k_in, k_act = jax.random.split(key, 3)
    params = make_params(k_params, num_inputs, num_outputs, hidden_size)
    inputs = jax.random.normal(k_in, (B, num_inputs), jnp.float32)
    actions = jax.random.normal(k_act, (B, num_outputs), jnp.float32)

    v = critic_forward(inputs, actions, params, target_steps=2)
    v = jax.block_until_ready(v)

    v_ref = critic_reference(inputs, actions, params, num_inputs, hidden_size)
    assert v.shape == (B, 1)
    assert jnp.allclose(v, v_ref, atol=1e-2, rtol=1e-2), \
        float(jnp.max(jnp.abs(v - v_ref)))
    print("KERNEL_OK")
</pallas_src>

<mosaic_0001>
module attributes {stable_mosaic.version = 11 : i64} {
  func.func @critic_kernel(%arg0: i32, %arg1: memref<20x128xbf16, #tpu.memory_space<vmem>>, %arg2: memref<36x1xf32, #tpu.memory_space<vmem>>, %arg3: memref<36x20xbf16, #tpu.memory_space<vmem>>, %arg4: memref<36x1xf32, #tpu.memory_space<vmem>>, %arg5: memref<64x36xbf16, #tpu.memory_space<vmem>>, %arg6: memref<64x1xf32, #tpu.memory_space<vmem>>, %arg7: memref<32x64xbf16, #tpu.memory_space<vmem>>, %arg8: memref<32x1xf32, #tpu.memory_space<vmem>>, %arg9: memref<32x1xf32, #tpu.memory_space<vmem>>, %arg10: memref<1x1xf32, #tpu.memory_space<vmem>>, %arg11: memref<1x128xf32, #tpu.memory_space<vmem>>) attributes {dimension_semantics = [#tpu.dimension_semantics<parallel>], iteration_bounds = array<i64: 2>, scalar_prefetch = 0 : i64, scratch_operands = 0 : i64, tpu.core_type = #tpu.core_type<tc>, window_params = [{transform_indices = @transform_0, window_bounds = array<i64: 20, 128>}, {pipeline_mode = #tpu.pipeline_mode<synchronous>, transform_indices = @transform_1, window_bounds = array<i64: 36, 1>}, {pipeline_mode = #tpu.pipeline_mode<synchronous>, transform_indices = @transform_2, window_bounds = array<i64: 36, 20>}, {pipeline_mode = #tpu.pipeline_mode<synchronous>, transform_indices = @transform_3, window_bounds = array<i64: 36, 1>}, {pipeline_mode = #tpu.pipeline_mode<synchronous>, transform_indices = @transform_4, window_bounds = array<i64: 64, 36>}, {pipeline_mode = #tpu.pipeline_mode<synchronous>, transform_indices = @transform_5, window_bounds = array<i64: 64, 1>}, {pipeline_mode = #tpu.pipeline_mode<synchronous>, transform_indices = @transform_6, window_bounds = array<i64: 32, 64>}, {pipeline_mode = #tpu.pipeline_mode<synchronous>, transform_indices = @transform_7, window_bounds = array<i64: 32, 1>}, {pipeline_mode = #tpu.pipeline_mode<synchronous>, transform_indices = @transform_8, window_bounds = array<i64: 32, 1>}, {pipeline_mode = #tpu.pipeline_mode<synchronous>, transform_indices = @transform_9, window_bounds = array<i64: 1, 1>}, {transform_indices = @transform_10, window_bounds = array<i64: 1, 128>}]} {
    %c0 = arith.constant 0 : index
    %c0_0 = arith.constant 0 : index
    %0 = vector.load %arg1[%c0, %c0_0] : memref<20x128xbf16, #tpu.memory_space<vmem>>, vector<20x128xbf16>
    %c0_1 = arith.constant 0 : index
    %c0_2 = arith.constant 0 : index
    %1 = vector.load %arg3[%c0_1, %c0_2] : memref<36x20xbf16, #tpu.memory_space<vmem>>, vector<36x20xbf16>
    %cst = arith.constant dense<0.000000e+00> : vector<36x128xf32>
    %2 = tpu.matmul %1, %0, %cst {dimension_numbers = #tpu.dot_dimension_numbers<[1], [0], [0], [1], [0, 0, 1, 1], [], []>} : vector<36x20xbf16>, vector<20x128xbf16>, vector<36x128xf32> -> vector<36x128xf32>
    %c0_3 = arith.constant 0 : index
    %c0_4 = arith.constant 0 : index
    %3 = vector.load %arg4[%c0_3, %c0_4] : memref<36x1xf32, #tpu.memory_space<vmem>>, vector<36x1xf32>
    %4 = vector.broadcast %3 : vector<36x1xf32> to vector<36x128xf32>
    %5 = arith.addf %2, %4 : vector<36x128xf32>
    %c0_5 = arith.constant 0 : index
    %c0_6 = arith.constant 0 : index
    %6 = vector.load %arg2[%c0_5, %c0_6] : memref<36x1xf32, #tpu.memory_space<vmem>>, vector<36x1xf32>
    %7 = vector.broadcast %6 : vector<36x1xf32> to vector<36x128xf32>
    %8 = arith.mulf %5, %7 : vector<36x128xf32>
    %9 = arith.maximumf %5, %8 : vector<36x128xf32>
    %c0_7 = arith.constant 0 : index
    %c0_8 = arith.constant 0 : index
    %10 = vector.load %arg5[%c0_7, %c0_8] : memref<64x36xbf16, #tpu.memory_space<vmem>>, vector<64x36xbf16>
    %11 = arith.truncf %9 : vector<36x128xf32> to vector<36x128xbf16>
    %cst_9 = arith.constant dense<0.000000e+00> : vector<64x128xf32>
    %12 = tpu.matmul %10, %11, %cst_9 {dimension_numbers = #tpu.dot_dimension_numbers<[1], [0], [0], [1], [0, 0, 1, 1], [], []>} : vector<64x36xbf16>, vector<36x128xbf16>, vector<64x128xf32> -> vector<64x128xf32>
    %c0_10 = arith.constant 0 : index
    %c0_11 = arith.constant 0 : index
    %13 = vector.load %arg6[%c0_10, %c0_11] : memref<64x1xf32, #tpu.memory_space<vmem>>, vector<64x1xf32>
    %14 = vector.broadcast %13 : vector<64x1xf32> to vector<64x128xf32>
    %15 = arith.addf %12, %14 : vector<64x128xf32>
    %c0_12 = arith.constant 0 : index
    %c0_13 = arith.constant 0 : index
    %16 = vector.load %arg7[%c0_12, %c0_13] : memref<32x64xbf16, #tpu.memory_space<vmem>>, vector<32x64xbf16>
    %17 = arith.truncf %15 : vector<64x128xf32> to vector<64x128xbf16>
    %cst_14 = arith.constant dense<0.000000e+00> : vector<32x128xf32>
    %18 = tpu.matmul %16, %17, %cst_14 {dimension_numbers = #tpu.dot_dimension_numbers<[1], [0], [0], [1], [0, 0, 1, 1], [], []>} : vector<32x64xbf16>, vector<64x128xbf16>, vector<32x128xf32> -> vector<32x128xf32>
    %c0_15 = arith.constant 0 : index
    %c0_16 = arith.constant 0 : index
    %19 = vector.load %arg8[%c0_15, %c0_16] : memref<32x1xf32, #tpu.memory_space<vmem>>, vector<32x1xf32>
    %20 = vector.broadcast %19 : vector<32x1xf32> to vector<32x128xf32>
    %21 = arith.addf %18, %20 : vector<32x128xf32>
    %cst_17 = arith.constant 0.000000e+00 : f32
    %22 = vector.broadcast %cst_17 : f32 to vector<32x128xf32>
    %23 = arith.maximumf %21, %22 : vector<32x128xf32>
    %c0_18 = arith.constant 0 : index
    %c0_19 = arith.constant 0 : index
    %24 = vector.load %arg9[%c0_18, %c0_19] : memref<32x1xf32, #tpu.memory_space<vmem>>, vector<32x1xf32>
    %25 = vector.broadcast %24 : vector<32x1xf32> to vector<32x128xf32>
    %26 = arith.mulf %23, %25 : vector<32x128xf32>
    %cst_20 = arith.constant dense<0.000000e+00> : vector<128xf32>
    %27 = vector.multi_reduction <add>, %26, %cst_20 [0] : vector<32x128xf32> to vector<128xf32>
    %28 = vector.shape_cast %27 : vector<128xf32> to vector<1x128xf32>
    %c0_21 = arith.constant 0 : index
    %c0_22 = arith.constant 0 : index
    %29 = vector.load %arg10[%c0_21, %c0_22] : memref<1x1xf32, #tpu.memory_space<vmem>>, vector<1x1xf32>
    %30 = vector.broadcast %29 : vector<1x1xf32> to vector<1x128xf32>
    %31 = arith.addf %28, %30 : vector<1x128xf32>
    %c0_23 = arith.constant 0 : index
    %c0_24 = arith.constant 0 : index
    %32 = vector.load %arg11[%c0_23, %c0_24] : memref<1x128xf32, #tpu.memory_space<vmem>>, vector<1x128xf32>
    tpu.vector_store %arg11[%c0_23, %c0_24], %31 {strides = array<i32>} : memref<1x128xf32, #tpu.memory_space<vmem>>, vector<1x128xf32>,
    return
  }
  func.func @transform_0(%arg0: i32) -> (i32, i32) {
    %c0_i32 = arith.constant 0 : i32
    %c0_i32_0 = arith.constant 0 : i32
    return %c0_i32, %arg0 : i32, i32
  }
  func.func @transform_1(%arg0: i32) -> (i32, i32) {
    %c0_i32 = arith.constant 0 : i32
    %c0_i32_0 = arith.constant 0 : i32
    %c0_i32_1 = arith.constant 0 : i32
    return %c0_i32, %c0_i32_0 : i32, i32
  }
  func.func @transform_2(%arg0: i32) -> (i32, i32) {
    %c0_i32 = arith.constant 0 : i32
    %c0_i32_0 = arith.constant 0 : i32
    %c0_i32_1 = arith.constant 0 : i32
    return %c0_i32, %c0_i32_0 : i32, i32
  }
  func.func @transform_3(%arg0: i32) -> (i32, i32) {
    %c0_i32 = arith.constant 0 : i32
    %c0_i32_0 = arith.constant 0 : i32
    %c0_i32_1 = arith.constant 0 : i32
    return %c0_i32, %c0_i32_0 : i32, i32
  }
  func.func @transform_4(%arg0: i32) -> (i32, i32) {
    %c0_i32 = arith.constant 0 : i32
    %c0_i32_0 = arith.constant 0 : i32
    %c0_i32_1 = arith.constant 0 : i32
    return %c0_i32, %c0_i32_0 : i32, i32
  }
  func.func @transform_5(%arg0: i32) -> (i32, i32) {
    %c0_i32 = arith.constant 0 : i32
    %c0_i32_0 = arith.constant 0 : i32
    %c0_i32_1 = arith.constant 0 : i32
    return %c0_i32, %c0_i32_0 : i32, i32
  }
  func.func @transform_6(%arg0: i32) -> (i32, i32) {
    %c0_i32 = arith.constant 0 : i32
    %c0_i32_0 = arith.constant 0 : i32
    %c0_i32_1 = arith.constant 0 : i32
    return %c0_i32, %c0_i32_0 : i32, i32
  }
  func.func @transform_7(%arg0: i32) -> (i32, i32) {
    %c0_i32 = arith.constant 0 : i32
    %c0_i32_0 = arith.constant 0 : i32
    %c0_i32_1 = arith.constant 0 : i32
    return %c0_i32, %c0_i32_0 : i32, i32
  }
  func.func @transform_8(%arg0: i32) -> (i32, i32) {
    %c0_i32 = arith.constant 0 : i32
    %c0_i32_0 = arith.constant 0 : i32
    %c0_i32_1 = arith.constant 0 : i32
    return %c0_i32, %c0_i32_0 : i32, i32
  }
  func.func @transform_9(%arg0: i32) -> (i32, i32) {
    %c0_i32 = arith.constant 0 : i32
    %c0_i32_0 = arith.constant 0 : i32
    %c0_i32_1 = arith.constant 0 : i32
    return %c0_i32, %c0_i32_0 : i32, i32
  }
  func.func @transform_10(%arg0: i32) -> (i32, i32) {
    %c0_i32 = arith.constant 0 : i32
    %c0_i32_0 = arith.constant 0 : i32
    return %c0_i32, %arg0 : i32, i32
  }
}

</mosaic_0001>

<bundles_post_ra>
// kernel: tpu_custom_call.1
= control target key start
LH: loop header
LB: loop body
LE: loop exit
PB: predicated region body
PF: predicated region fallthrough
CT: control target
= control target key end

     0   :  { %s1466_s0 = inlined_call_operand.vmem [shape: bf16[20,256], index: 0, kind: input, shape index: {}]   ;;  %s1467_s1 = inlined_call_operand.vmem [shape: f32[36,1], index: 1, kind: input, shape index: {}]   ;;  %s1468_s2 = inlined_call_operand.vmem [shape: bf16[36,20], index: 2, kind: input, shape index: {}]   ;;  %s1469_s3 = inlined_call_operand.vmem [shape: f32[36,1], index: 3, kind: input, shape index: {}]   ;;  %s1470_s4 = inlined_call_operand.vmem [shape: bf16[64,36], index: 4, kind: input, shape index: {}]   ;;  %s1471_s5 = inlined_call_operand.vmem [shape: f32[64,1], index: 5, kind: input, shape index: {}]   ;;  %s1472_s6 = inlined_call_operand.vmem [shape: bf16[32,64], index: 6, kind: input, shape index: {}]   ;;  %s1473_s7 = inlined_call_operand.vmem [shape: f32[32,1], index: 7, kind: input, shape index: {}]   ;;  %s1474_s8 = inlined_call_operand.vmem [shape: f32[32,1], index: 8, kind: input, shape index: {}]   ;;  %s1475_s9 = inlined_call_operand.<no memory space> [shape: f32[1,1], index: 9, kind: input, shape index: {}]   ;;  %s1476_s10 = inlined_call_operand.hbm [shape: f32[1,256], index: 10, kind: output, shape index: {}]  }
   0x1   :  { %v15_v0 = vstv %s1475_s9 }
   0x2   :  { %16 = vst [vmem:[#allocation2] sm:$0x1] %v15_v0 }
   0x3   :  { %17 = vsyncpa [#allocation5], 0 }
   0x4   :  { %19 = vsyncpa [#allocation5 + $0x1], 0  ;;  %s1236_s15 = smov 0   ;;  %s1238_s16 = smov 0  }
   0x5   :  { %s1240_s17 = smov 0   ;;  %s1242_s18 = smov 0  }
   0x6 LB: > { %s963_s9 = sadd.s32 4294967295, %s1172_s18   ;;  %s964_s19 = sadd.s32 4294967294, %s1172_s18   ;;  %s1172_s18 = sphi %s1242_s18, %s1482_s18   ;;  %s1168_s17 = sphi %s1240_s17, %s1481_s17   ;;  %s1164_s16 = sphi %s1238_s16, %s1480_s16   ;;  %s1160_s15 = sphi %s1236_s15, %s1479_s15  }
   0x7   : > { %s1259_s20 = sadd.s32 1, %s1172_s18   ;;  %s32_s21 = sadd.s32 1, %s1168_s17 }
   0x8   : > { %s29_s22 = ssub.s32 %s1172_s18, %s1259_s20  ;;  %p39_p0 = scmp.ne.s32.totalorder %s1168_s17, %s1164_s16 }
   0x9   : > { %p30_p1 = scmp.eq.s32.totalorder %s29_s22, 0  ;;  %p40_p2 = scmp.eq.s32.totalorder %s1172_s18, 0 }
   0xa   : > { %p258_p3 = scmp.eq.s32.totalorder %s963_s9, 1  ;;  %p263_p4 = scmp.ne.s32.totalorder %s1164_s16, %s1160_s15 }
   0xb   : > { %s1272_s23 = scalar_select %p30_p1, %s1168_s17, %s32_s21  }
   0xc   : > { %p41_p5 = por %p40_p2, %p39_p0  ;;  %p1274_p6 = por %p258_p3, %p39_p0 }
   0xd   : > { %p264_p7 = scmp.eq.s32.totalorder %s964_s19, 1  ;;  %p966_p9 = scmp.ge.s32.totalorder %s1172_s18, 2 }
   0xf   : > { %p1278_p8 = por %p264_p7, %p263_p4  ;;  %307 = sbr.rel (%p966_p9) target bundleno = 29 (0x1d), region = 52 }
  0x16   : > { %310 = sbr.rel (!%p41_p5) target bundleno = 29 (0x1d), region = 56  ;;  %s312_s26 = sand.u32 (%p41_p5), 1, %s1168_s17  }
  0x17   : > { %s967_s27 = sshll.u32 (%p41_p5), %s1172_s18, 2  ;;  %s1053_s28 = smul.u32 (%p41_p5), 12, %s312_s26 }
  0x18   : > { %s316_s11 = scalar_lea.vmem (%p41_p5), %s1466_s0, %s967_s27 }
  0x19   : > { %v332_v1 = vld [vmem:[%s316_s11] sm:$0xf] (%p41_p5)  ;;  %v334_v2 = vld [vmem:[%s316_s11 + $0x8] sm:$0xf] (%p41_p5)  ;;  %v336_v3 = vld [vmem:[%s316_s11 + $0x10] sm:$0xf] (%p41_p5) }
  0x1a   : > { %s314_s12 = scalar_lea.vmem (%p41_p5), [#allocation3], %s1053_s28 }
  0x1b   : > { %333 = vst [vmem:[%s314_s12] sm:$0xf] (%p41_p5), %v332_v1  ;;  %335 = vst [vmem:[%s314_s12 + $0x4] sm:$0xf] (%p41_p5), %v334_v2 }
  0x1c   : > { %337 = vst [vmem:[%s314_s12 + $0x8] sm:$0xf] (%p41_p5), %v336_v3 }
  0x1d PF: > { %p968_p10 = scmp.ge.s32.totalorder %s1172_s18, 1  ;;  %p365_p11 = scmp.lt.s32.totalorder %s1172_s18, 3 }
  0x1f   : > { %p366_p12 = pnand %p968_p10, %p365_p11 }
  0x20   : > { %s1293_s13 = sand.u32 (!%p366_p12), 1, %s1164_s16   ;;  %v1174_v4 = vmov (!%p366_p12), 0.0   ;;  %vm1175_vm0 = vmmov (!%p366_p12), 0   ;;  %v417_v5 = vld [vmem:[%s1469_s3] sm:$0xff] (!%p366_p12)  ;;  %vm479_vm1 = vcmask (!%p366_p12), 1041408   ;;  %v1176_v7 = vmov (!%p366_p12), 0  }
  0x21   : > { %369 = sbr.rel (%p366_p12) target bundleno = 775 (0x307), region = 97  ;;  %1010 = vmatprep.subr.bf16.mxu0 (!%p366_p12), %v1174_v4  ;;  %1014 = vmatprep.mubr.msk.bf16.mxu0 (!%p366_p12), %vm1175_vm0, %v1174_v4  ;;  %v418_v9 = vld [vmem:[%s1469_s3 + $0x8] sm:$0xff] (!%p366_p12)  ;;  %v539_v10 = vld [vmem:[%s1467_s1] sm:$0xff] (!%p366_p12)  ;;  %vm469_vm2 = vcmask (!%p366_p12), 162816   ;;  %v419_v14 = vld [vmem:[%s1469_s3 + $0x10] sm:$0xff] (!%p366_p12)  ;;  %vm658_vm3 = vcmask (!%p366_p12), 293888  }
  0x22   : > { %s1054_s14 = smul.u32 (!%p366_p12), 12, %s1293_s13  ;;  %1097 = vset.pattern.permute.xlu0 (!%p366_p12), %v1176_v7  ;;  %1098 = vset.pattern.permute.xlu1 (!%p366_p12), %v1176_v7  ;;  %v540_v12 = vld [vmem:[%s1467_s1 + $0x8] sm:$0xff] (!%p366_p12)  ;;  %v1101_v13 = vld [vmem:[%s1468_s2] sm:$0xff] (!%p366_p12)   ;;  %v420_v15 = vld [vmem:[%s1469_s3 + $0x18] sm:$0xff] (!%p366_p12)  ;;  %vm781_vm4 = vcmask (!%p366_p12), 523264   ;;  %s989_s28 = sshll.u32 (!%p366_p12), %s963_s9, 4 }
  0x23   : > { %424 = vperm.xlu0 (!%p366_p12), %1097, %v417_v5   ;;  %546 = vperm.xlu1 (!%p366_p12), %1098, %v539_v10   ;;  %v541_v16 = vld [vmem:[%s1467_s1 + $0x10] sm:$0xff] (!%p366_p12)  ;;  %v542_v17 = vld [vmem:[%s1467_s1 + $0x18] sm:$0xff] (!%p366_p12)  ;;  %v1102_v18 = vld [vmem:[%s1468_s2 + $0x8] sm:$0xff] (!%p366_p12)   ;;  %s407_s29 = scalar_lea.vmem (!%p366_p12), [#allocation4], %s1293_s13  ;;  %s891_s19 = scalar_lea.sflag (!%p366_p12), [#allocation5], %s1293_s13 }
  0x24   : > { %s374_s22 = scalar_lea.vmem (!%p366_p12), [#allocation3], %s1054_s14  ;;  %v421_v19 = vld [vmem:[%s1469_s3 + $0x20] sm:$0xf] (!%p366_p12)  ;;  %v591_v22 = vld [vmem:[%s1471_s5 + $0x8] sm:$0xff] (!%p366_p12)  ;;  %v592_v24 = vld [vmem:[%s1471_s5 + $0x10] sm:$0xff] (!%p366_p12)  ;;  %s903_s30 = sshll.u32 (!%p366_p12), %s407_s29, 4  ;;  %s1424_s30 = int_to_ptr.vmem [resolvable:$true] %s903_s30 }
  0x25   : > { %v1099_v6 = vld [vmem:[%s374_s22] sm:$0xff] (!%p366_p12)   ;;  %v1100_v8 = vld [vmem:[%s374_s22 + $0x8] ss:$0 sps:$4 sm:$0x33] (!%p366_p12)   ;;  %v593_v25 = vld [vmem:[%s1471_s5 + $0x18] sm:$0xff] (!%p366_p12)  ;;  %s1422_s14 = scalar_lea.hbm (!%p366_p12), %s1476_s10, %s989_s28  ;;  %s1110_s21 = scalar_lea.vmem (!%p366_p12), %s1424_s30, 16 }
  0x26   : > { %1011 = vmatpush3.bf16.msra.mxu0 (!%p366_p12), %v1099_v6  ;;  %v481_v11 = vsel (!%p366_p12), %vm479_vm1, %v1100_v8, 0  ;;  %v543_v20 = vld [vmem:[%s1467_s1 + $0x20] sm:$0xf] (!%p366_p12)  ;;  %v1103_v23 = vld [vmem:[%s1468_s2 + $0x10] ss:$0 sps:$4 sm:$0x33] (!%p366_p12)   ;;  %p1111_p13 = scmp.ne.s32.totalorder (!%p366_p12), %s1424_s30, %s1110_s21 }
  0x27   : > { %1012 = vmatprep.subr.bf16.mxu0 (!%p366_p12), %v1174_v4  ;;  %429 = vperm.xlu0 (!%p366_p12), %1097, %v418_v9   ;;  %v590_v21 = vld [vmem:[%s1471_s5] sm:$0xff] (!%p366_p12)  ;;  %v595_v27 = vld [vmem:[%s1471_s5 + $0x28] sm:$0xff] (!%p366_p12)  ;;  %v596_v28 = vld [vmem:[%s1471_s5 + $0x30] sm:$0xff] (!%p366_p12)  ;;  %s1177_s9 = smov (!%p366_p12), [#allocation4]  }
  0x28   : > { %551 = vperm.xlu1 %1098, %v540_v12   ;;  %v594_v26 = vld [vmem:[%s1471_s5 + $0x20] sm:$0xff]  ;;  %v597_v29 = vld [vmem:[%s1471_s5 + $0x38] sm:$0xff]  ;;  %v748_v31 = vld [vmem:[%s1473_s7 + $0x8] sm:$0xff]  ;;  %p1112_p0 = pnand %p1111_p13, %p1274_p6  ;;  %s1114_s22 = sshll.u32 %s1177_s9, 4  ;;  %s1115_s22 = int_to_ptr.vmem [resolvable:$false] %s1114_s22 }
  0x29   : > { %v747_v30 = vld [vmem:[%s1473_s7] sm:$0xff]  ;;  %v749_v32 = vld [vmem:[%s1473_s7 + $0x10] sm:$0xff]  ;;  %v750_v33 = vld [vmem:[%s1473_s7 + $0x18] sm:$0xff]  ;;  %s1116_s26 = scalar_lea.vmem %s1115_s22, 32  ;;  %p1117_p2 = scmp.lt.s32.totalorder %s1424_s30, %s1115_s22 }
  0x2a   : > { %1013 = vmatpush3.bf16.msra.mxu0 %v481_v11  ;;  %v841_v34 = vld [vmem:[%s1474_s8] sm:$0xff]  ;;  %v842_v35 = vld [vmem:[%s1474_s8 + $0x8] sm:$0xff]  ;;  %v843_v36 = vld [vmem:[%s1474_s8 + $0x10] sm:$0xff]  ;;  %p1113_p1 = pneg %p1112_p0  ;;  %p1118_p3 = scmp.lt.s32.totalorder %s1116_s26, %s1110_s21 }
  0x2b   : > { %434 = vperm.xlu0 %1097, %v419_v14   ;;  %v844_v37 = vld [vmem:[%s1474_s8 + $0x18] sm:$0xff]  ;;  %v878_v38 = vld [vmem:[#allocation2] sm:$0x1] }
  0x2c   : > { %439 = vperm.xlu1 %1098, %v420_v15   ;;  %v1104_v39 = vld [vmem:[%s1470_s4] sm:$0xff]   ;;  %p1119_p4 = por %p1118_p3, %p1117_p2 }
  0x2d   : > { %1015 = vmatmul.mubr.msk.bf16.vlgmr.msra.gmra.mrb[0].mxu0 %vm469_vm2, %v1101_v13  ;;  %1032 = vmatprep.mubr.msk.bf16.mxu1 %vm658_vm3, %v1104_v39 }
  0x2e   : > { %1018 = vmatprep.mubr.msk.bf16.mxu0 %vm1175_vm0, %v1174_v4  ;;  %p1120_p5 = pnand %p1119_p4, %p1113_p1 }
  0x2f   : > { %556 = vperm.xlu0 %1097, %v541_v16  }
  0x30   : > { %561 = vperm.xlu1 %1098, %v542_v17   ;;  %v1105_v17 = vld [vmem:[%s1470_s4 + $0x8] sm:$0xff]  }
  0x33   : > { %444 = vperm.xlu0 %1097, %v421_v19   ;;  %v1107_v19 = vld [vmem:[%s1470_s4 + $0x18] sm:$0xff]  }
  0x34   : > { %566 = vperm.xlu1 %1098, %v543_v20   ;;  %v1108_v20 = vld [vmem:[%s1472_s6] sm:$0xff]  }
  0x35   : > { %1019 = vmatmul.mubr.msk.bf16.gmra.mrb[4].mxu0 %vm469_vm2, %v1102_v18  ;;  %v1106_v18 = vld [vmem:[%s1470_s4 + $0x10] sm:$0xff]  }
  0x36   : > { %1022 = vmatprep.mubr.msk.bf16.mxu0 %vm1175_vm0, %v1174_v4 }
  0x37   : > { %600 = vperm.xlu0 %1097, %v590_v21  }
  0x38   : > { %605 = vperm.xlu1 %1098, %v591_v22  }
  0x3b   : > { %610 = vperm.xlu0 %1097, %v592_v24  }
  0x3c   : > { %615 = vperm.xlu1 %1098, %v593_v25  }
  0x3d   : > { %1023 = vmatmul.mubr.msk.bf16.gmra.mrb[8].mxu0 %vm469_vm2, %v1103_v23 }
  0x3f   : > { %620 = vperm.xlu0 %1097, %v594_v26  }
  0x40   : > { %625 = vperm.xlu1 %1098, %v595_v27  }
  0x43   : > { %630 = vperm.xlu0 %1097, %v596_v28  }
  0x44   : > { %635 = vperm.xlu1 %1098, %v597_v29  }
  0x47   : > { %753 = vperm.xlu0 %1097, %v747_v30  }
  0x48   : > { %758 = vperm.xlu1 %1098, %v748_v31  }
  0x4b   : > { %763 = vperm.xlu0 %1097, %v749_v32  }
  0x4c   : > { %768 = vperm.xlu1 %1098, %v750_v33  }
  0x4f   : > { %847 = vperm.xlu0 %1097, %v841_v34  }
  0x50   : > { %852 = vperm.xlu1 %1098, %v842_v35  }
  0x53   : > { %857 = vperm.xlu0 %1097, %v843_v36  }
  0x54   : > { %862 = vperm.xlu1 %1098, %v844_v37  }
  0x57   : > { %881 = vperm.xlu0 %1097, %v878_v38  }
  0xa2   : > { %v425_v40 = vpop.permute.xlu0 %424  ;;  %v547_v41 = vpop.permute.xlu1 %546 }
  0xa6   : > { %v430_v42 = vpop.permute.xlu0 %429 }
  0xa7   : > { %v552_v43 = vpop.permute.xlu1 %551 }
  0xaa   : > { %v435_v51 = vpop.permute.xlu0 %434 }
  0xab   : > { %v440_v53 = vpop.permute.xlu1 %439 }
  0xae   : > { %v557_v60 = vpop.permute.xlu0 %556 }
  0xaf   : > { %v562_v1 = vpop.permute.xlu1 %561 }
  0xb2   : > { %v445_v5 = vpop.permute.xlu0 %444 }
  0xb3   : > { %v567_v10 = vpop.permute.xlu1 %566 }
  0xb6   : > { %v601_v21 = vpop.permute.xlu0 %600 }
  0xb7   : > { %v606_v22 = vpop.permute.xlu1 %605 }
  0xba   : > { %v611_v23 = vpop.permute.xlu0 %610 }
  0xbb   : > { %v616_v24 = vpop.permute.xlu1 %615 }
  0xbe   : > { %v621_v28 = vpop.permute.xlu0 %620 }
  0xbf   : > { %v626_v32 = vpop.permute.xlu1 %625 }
  0xc2   : > { %v631_v38 = vpop.permute.xlu0 %630 }
 0x100   : > { %v517_v44 = vpop.f32.mrb[0].mxu0 }
 0x101   : > { %v518_v45 = vadd.f32 %v517_v44, %v425_v40  ;;  %v1016_v46 = vpop.f32.mrb[1].mxu0  ;;  %v636_v40 = vpop.permute.xlu1 %635 }
 0x102   : > { %v520_v47 = vpop.f32.mrb[2].mxu0 }
 0x103   : > { %v569_v48 = vmul.f32 %v547_v41, %v518_v45  ;;  %v521_v49 = vadd.f32 %v520_v47, %v430_v42  ;;  %v1017_v50 = vpop.f32.mrb[3].mxu0 }
 0x104   : > { %v754_v50 = vpop.permute.xlu0 %753 }
 0x105   : > { %v570_v52 = vmul.f32 %v552_v43, %v521_v49  ;;  %v574_v54 = vmax.f32 %v518_v45, %v569_v48 }
 0x107   : > { %v575_v55 = vmax.f32 %v521_v49, %v570_v52  ;;  %v1109_v49 = vld [vmem:[%s1472_s6 + $0x8] sm:$0xff]  }
 0x108   : > { %v525_v56 = vpop.f32.mrb[4].mxu0  ;;  %v764_v52 = vpop.permute.xlu0 %763 }
 0x109   : > { %v526_v57 = vadd.f32 %v525_v56, %v435_v51  ;;  %v1020_v58 = vpop.f32.mrb[5].mxu0  ;;  %v587_v59 = vpack.c.bf16 %v575_v55, %v574_v54  ;;  %v759_v51 = vpop.permute.xlu1 %758 }
 0x10a   : > { %v528_v61 = vpop.f32.mrb[6].mxu0 }
 0x10b   : > { %v571_v62 = vmul.f32 %v557_v60, %v526_v57  ;;  %v529_v63 = vadd.f32 %v528_v61, %v440_v53  ;;  %v1021_v0 = vpop.f32.mrb[7].mxu0  ;;  %1026 = vmatprep.subr.bf16.mxu1 %v587_v59 }
 0x10c   : > { %1027 = vmatpush3.bf16.msra.mxu1 %v587_v59  ;;  %v848_v59 = vpop.permute.xlu0 %847 }
 0x10d   : > { %v572_v2 = vmul.f32 %v562_v1, %v529_v63  ;;  %v576_v3 = vmax.f32 %v526_v57, %v571_v62  ;;  %v769_v53 = vpop.permute.xlu1 %768 }
 0x10f   : > { %v577_v4 = vmax.f32 %v529_v63, %v572_v2 }
 0x110   : > { %v533_v6 = vpop.f32.mrb[8].mxu0 }
 0x111   : > { %v534_v7 = vadd.f32 %v533_v6, %v445_v5  ;;  %v1024_v8 = vpop.f32.mrb[9].mxu0  ;;  %v588_v9 = vpack.c.bf16 %v577_v4, %v576_v3  ;;  %v853_v0 = vpop.permute.xlu1 %852 }
 0x112   : > { %v536_v11 = vpop.f32.mrb[10].mxu0  ;;  %v858_v6 = vpop.permute.xlu0 %857 }
 0x113   : > { %v573_v12 = vmul.f32 %v567_v10, %v534_v7  ;;  %v1025_v13 = vpop.f32.mrb[11].mxu0  ;;  %1028 = vmatprep.subr.bf16.mxu1 %v588_v9 }
 0x114   : > { %1029 = vmatpush3.bf16.msra.mxu1 %v588_v9 }
 0x115   : > { %v578_v14 = vmax.f32 %v534_v7, %v573_v12  ;;  %v863_v9 = vpop.permute.xlu1 %862  ;;  %v884_v12 = vlaneseq }
 0x117   : > { %v589_v15 = vpack.c.bf16 %v578_v14, %v578_v14 }
 0x119   : > { %1052 = vmatprep.subr.msk.bf16.mxu1 %vm479_vm1, %v589_v15  ;;  %v672_v16 = vsel %vm479_vm1, %v589_v15, 0  ;;  %v885_v15 = vshrl.u32 %v884_v12, 7 }
 0x11a   : > { %1031 = vmatpush3.bf16.msra.mxu1 %v672_v16 }
 0x11d   : > { %1033 = vmatmul.mubr.msk.bf16.vlgmr.msra.gmra.mrb[0].mxu1 %vm658_vm3, %v1105_v17 }
 0x11e   : > { %1036 = vmatprep.mubr.msk.bf16.mxu1 %vm658_vm3, %v1106_v18  ;;  %v886_v18 = vsub.s32 0, %v885_v15 }
 0x125   : > { %1037 = vmatmul.mubr.msk.bf16.gmra.mrb[4].mxu1 %vm658_vm3, %v1107_v19 }
 0x126   : > { %1048 = vmatprep.mubr.msk.bf16.mxu1 %vm781_vm4, %v1108_v20  ;;  %v882_v20 = vpop.permute.xlu0 %881 }
 0x1f0   : > { %v1034_v25 = vpop.f32.mrb[0].mxu1 }
 0x1f1   : > { %v708_v26 = vpop.f32.mrb[1].mxu1  ;;  %v717_v29 = vadd.f32 %v1034_v25, %v611_v23 }
 0x1f2   : > { %v1035_v27 = vpop.f32.mrb[2].mxu1  ;;  %v709_v33 = vadd.f32 %v708_v26, %v601_v21 }
 0x1f3   : > { %v720_v30 = vadd.f32 %v1035_v27, %v616_v24  ;;  %v711_v31 = vpop.f32.mrb[3].mxu1 }
 0x1f4   : > { %v712_v34 = vadd.f32 %v711_v31, %v606_v22  ;;  %v887_v22 = vrot.slane %v882_v20, %v886_v18 }
 0x1f5   : > { %v744_v35 = vpack.c.bf16 %v720_v30, %v717_v29 }
 0x1f6   : > { %v743_v36 = vpack.c.bf16 %v712_v34, %v709_v33 }
 0x1f8   : > { %v1038_v37 = vpop.f32.mrb[4].mxu1  ;;  %1040 = vmatprep.subr.bf16.mxu1 %v743_v36 }
 0x1f9   : > { %v724_v39 = vpop.f32.mrb[5].mxu1  ;;  %1041 = vmatpush3.bf16.msra.mxu1 %v743_v36  ;;  %v733_v42 = vadd.f32 %v1038_v37, %v631_v38 }
 0x1fa   : > { %v1039_v41 = vpop.f32.mrb[6].mxu1  ;;  %1042 = vmatprep.subr.bf16.mxu1 %v744_v35  ;;  %v725_v45 = vadd.f32 %v724_v39, %v621_v28 }
 0x1fb   : > { %v736_v43 = vadd.f32 %v1039_v41, %v636_v40  ;;  %v727_v44 = vpop.f32.mrb[7].mxu1 }
 0x1fc   : > { %v728_v46 = vadd.f32 %v727_v44, %v626_v32 }
 0x1fd   : > { %v746_v47 = vpack.c.bf16 %v736_v43, %v733_v42  ;;  %1043 = vmatpush3.bf16.msra.mxu1 %v744_v35 }
 0x1fe   : > { %v745_v48 = vpack.c.bf16 %v728_v46, %v725_v45 }
 0x200   : > { %1044 = vmatprep.subr.bf16.mxu1 %v745_v48 }
 0x201   : > { %1045 = vmatpush3.bf16.msra.mxu1 %v745_v48 }
 0x202   : > { %1046 = vmatprep.subr.bf16.mxu1 %v746_v47 }
 0x205   : > { %1047 = vmatpush3.bf16.msra.mxu1 %v746_v47 }
 0x208   : > { %1049 = vmatmul.mubr.msk.bf16.vlgmr.msra.gmra.mrb[8].mxu1 %vm781_vm4, %v1109_v49 }
 0x2db   : > { %v1050_v54 = vpop.f32.mrb[8].mxu1 }
 0x2dc   : > { %v822_v55 = vpop.f32.mrb[9].mxu1  ;;  %v831_v56 = vadd.f32 %v1050_v54, %v764_v52 }
 0x2dd   : > { %v823_v57 = vadd.f32 %v822_v55, %v754_v50  ;;  %v1051_v58 = vpop.f32.mrb[10].mxu1 }
 0x2de   : > { %v825_v60 = vpop.f32.mrb[11].mxu1  ;;  %v834_v62 = vadd.f32 %v1051_v58, %v769_v53  ;;  %v839_v1 = vmax.f32 %v831_v56, 0.0 }
 0x2df   : > { %v837_v61 = vmax.f32 %v823_v57, 0.0  ;;  %v826_v63 = vadd.f32 %v825_v60, %v759_v51 }
 0x2e0   : > { %v840_v4 = vmax.f32 %v834_v62, 0.0  ;;  %v867_v7 = vmul.f32 %v858_v6, %v839_v1 }
 0x2e1   : > { %v838_v2 = vmax.f32 %v826_v63, 0.0  ;;  %v865_v3 = vmul.f32 %v848_v59, %v837_v61 }
 0x2e2   : > { %v868_v10 = vmul.f32 %v863_v9, %v840_v4 }
 0x2e3   : > { %v866_v5 = vmul.f32 %v853_v0, %v838_v2 }
 0x2e5   : > { %v869_v8 = vadd.f32 %v866_v5, %v865_v3 }
 0x2e7   : > { %v870_v11 = vadd.f32 %v869_v8, %v867_v7 }
 0x2e9   : > { %v871_v13 = vadd.f32 %v870_v11, %v868_v10 }
 0x2eb   : > { %v872_v14 = vrot.slane %v871_v13, 4 }
 0x2ed   : > { %v873_v16 = vadd.f32 %v872_v14, %v871_v13 }
 0x2ef   : > { %v874_v17 = vrot.slane %v873_v16, 2 }
 0x2f1   : > { %v875_v19 = vadd.f32 %v874_v17, %v873_v16 }
 0x2f3   : > { %v876_v21 = vrot.slane %v875_v19, 1 }
 0x2f5   : > { %v877_v23 = vadd.f32 %v876_v21, %v875_v19 }
 0x2f7   : > { %v888_v24 = vadd.f32 %v887_v22, %v877_v23 }
 0x2f9   : > { %889 = vst [vmem:[%s407_s29] sm:$0x1] %v888_v24 }
 0x2fa   : > { %1123 = shalt.err (!%p1120_p5)
}
 0x2fb   : > { %s1124_s13 = scalar_lea.hbm %s1422_s14, 16  ;;  %s1128_s29 = scalar_lea.hbm %s1476_s10, 32 }
 0x2fc   : > { %p1125_p7 = scmp.ne.s32.totalorder %s1422_s14, %s1124_s13  ;;  %p1129_p12 = scmp.lt.u32.totalorder %s1422_s14, %s1476_s10 }
 0x2fd   : > { %p1130_p13 = scmp.lt.u32.totalorder %s1128_s29, %s1124_s13  ;;  %p1132_p1 = scmp.lt.u32.totalorder %s1124_s13, %s1422_s14 }
 0x2fe   : > { %p1126_p10 = pnand %p1125_p7, %p1274_p6 }
 0x2ff   : > { %p1131_p0 = por %p1130_p13, %p1129_p12 }
 0x300   : > { %p1127_p11 = pneg %p1126_p10 }
 0x301   : > { %p1133_p2 = por %p1132_p1, %p1131_p0 }
 0x303   : > { %p1134_p3 = pnand %p1133_p2, %p1127_p11 }
 0x305   : > { %1137 = shalt.err (!%p1134_p3)
}
 0x306   : > { %1055 = dma.vmem_to_hbm [thread:$0]  (%p1274_p6), %s1424_s30, 16, %s1422_s14, %s891_s19  }
 0x307 PF: > { %s915_s21 = sand.u32 1, %s1160_s15   ;;  %p1058_p4 = pnand %p966_p9, %p1278_p8 }
 0x308   : > { %s916_s9 = scalar_lea.sflag [#allocation5], %s915_s21 }
 0x309   : > { %1155 = dma.done.wait (!%p1058_p4), %s916_s9, 16  }
 0x30a   : > { %1157 = vsyncadd (!%p1058_p4), %s916_s9, 4294967280  ;;  %p22_p5 = scmp.ge.s32.totalorder %s1259_s20, 4   ;;  %s1479_s15 = smov %s1164_s16 }
 0x30b   : > { %s1480_s16 = smov %s1168_s17  ;;  %s1481_s17 = smov %s1272_s23 }
 0x30c   : > { %s1482_s18 = smov %s1259_s20  ;;  %24 = sbr.rel (!%p22_p5) target bundleno = 6 (0x6), region = 141 }
 0x313   :  { %920 = vsyncpa [#allocation5], 1 }
 0x314   :  { %922 = vsyncpa [#allocation5 + $0x1], 1 }

</bundles_post_ra>
